<compile_context>
chip_gen: v7x
topology: tpu7x:2x2x1
jax: 0.10.0
libtpu: 0.0.40
codegen_flags: <defaults>
</compile_context>

<pallas_src>
import jax
import jax.numpy as jnp
from jax.experimental import pallas as pl
from jax.experimental.pallas import tpu as pltpu


_LANE = 128
_TAP_OFFSETS = ((-1, -1), (-1, 0), (-1, 1),
                (0, -1),  (0, 0),  (0, 1),
                (1, -1),  (1, 0),  (1, 1))


# --------------------------- chip-aware tiling ---------------------------

def _chip_budget():
    """Returns (input-block budget bytes, VMEM capacity bytes) for this chip."""
    cap = None
    try:
        cap = int(pltpu.get_tpu_info().vmem_capacity_bytes)
    except Exception:
        cap = None
    kind = ""
    try:
        kind = jax.devices()[0].device_kind.lower()
    except Exception:
        pass
    if cap is not None and cap <= 80 * 1024 * 1024:
        # v7x-class part: 64 MiB VMEM per TensorCore -> keep blocks modest.
        return 3 * 1024 * 1024, cap
    if cap is None:
        cap = 128 * 1024 * 1024
    if ("v5 lite" in kind) or ("v5e" in kind) or ("v5lite" in kind):
        # v5e: single vector-store slot + small scoped default -> small blocks.
        return 2 * 1024 * 1024, cap
    # v6e / other 128 MiB parts: bigger blocks get closer to the HBM roofline.
    return 8 * 1024 * 1024, cap


def _pick_tiles(C, H, W, itemsize, budget):
    """Pick (TC, TH): channel tile (lane-dense) and row tile (divisor of H)."""
    if C % _LANE == 0:
        tc_cands = [t for t in range(C, 0, -_LANE) if C % t == 0]
    else:
        tc_cands = [C]                      # full-C block (legal, masked lanes)
    h_divs = sorted([d for d in range(1, H + 1) if H % d == 0], reverse=True)
    for tc in tc_cands:
        for th in h_divs:
            if th * W * tc * itemsize <= budget:
                return tc, th
    # Even a single row at the smallest legal channel tile exceeds the budget:
    # take the minimal block and let the explicit vmem_limit (or a loud error
    # in dwconv_pallas) handle it.
    return tc_cands[-1], 1


# ------------------------------ the kernel -------------------------------

def _make_dwconv_kernel(H, W, TH, compute_dtype):
    def kernel(xm_ref, xt_ref, xb_ref, w_ref, b_ref, o_ref):
        th_idx = pl.program_id(2)
        cdt = compute_dtype

        xm = xm_ref[0].astype(cdt)        # (TH, W, TC)   main row tile
        x_top = xt_ref[0].astype(cdt)     # (1,  W, TC)   halo row above
        x_bot = xb_ref[0].astype(cdt)     # (1,  W, TC)   halo row below
        wts = w_ref[...].astype(cdt)      # (9, TC)

        if TH > 1:
            x_up = jnp.concatenate([x_top, xm[:-1]], axis=0)   # x[r-1]
            x_dn = jnp.concatenate([xm[1:], x_bot], axis=0)    # x[r+1]
        else:
            x_up, x_dn = x_top, x_bot

        # Boundary masks (global row index, column index).
        grow = jax.lax.broadcasted_iota(jnp.int32, (TH, 1, 1), 0) + th_idx * TH
        not_top = (grow >= 1).astype(cdt)
        not_bot = (grow <= H - 2).astype(cdt)
        col = jax.lax.broadcasted_iota(jnp.int32, (1, W, 1), 1)
        not_left = (col >= 1).astype(cdt)
        not_right = (col <= W - 2).astype(cdt)

        rows = {-1: (x_up, not_top), 0: (xm, None), 1: (x_dn, not_bot)}

        acc = (xm * wts[4]).astype(jnp.float32)           # center tap
        for k, (dy, dx) in enumerate(_TAP_OFFSETS):
            if dy == 0 and dx == 0:
                continue
            base, rmask = rows[dy]
            if dx == 0:
                shifted = base
            else:
                # shifted[w] = base[w + dx]; wrap-around masked below (XLU roll)
                shifted = pltpu.roll(base, (-dx) % W, axis=1)
                shifted = shifted * (not_left if dx == -1 else not_right)
            if rmask is not None:
                shifted = shifted * rmask
            acc = acc + (shifted * wts[k]).astype(jnp.float32)

        acc = acc + b_ref[...].astype(jnp.float32)
        o_ref[0] = acc.astype(o_ref.dtype)

    return kernel


def dwconv_pallas(x_bnc, weight, bias, H, W, max_rows_per_tile=None):
    """Depthwise 3x3 conv (stride 1, pad 1, groups=C) matching DWConv.forward.

    x_bnc:  (B, N, C) with N == H*W (row-major flattened NHWC)
    weight: (C, 1, 3, 3)  PyTorch depthwise Conv2d weight layout
    bias:   (C,)
    returns (B, N, C), same dtype as x_bnc (f32 compute, bf16 compute for bf16 I/O)
    """
    B, N, C = x_bnc.shape
    assert N == H * W, f"N={N} must equal H*W={H * W}"
    io_dtype = x_bnc.dtype
    compute_dtype = jnp.bfloat16 if io_dtype == jnp.bfloat16 else jnp.float32
    itemsize = jnp.dtype(io_dtype).itemsize

    budget, vmem_cap = _chip_budget()
    TC, TH = _pick_tiles(C, H, W, itemsize, budget)
    if max_rows_per_tile is not None:           # testing / manual override
        TH = min(TH, max(1, int(max_rows_per_tile)))
        while H % TH:
            TH -= 1
    # v7x megacore: make sure there is more than one grid step to shard.
    if (C // TC) * B * (H // TH) < 2 and TH > 1:
        TH = max(d for d in range(1, TH) if H % d == 0)

    # (B, N, C) -> (B, H, W, C) is a metadata-only reshape (no copy).
    x4 = x_bnc.reshape(B, H, W, C)
    # Weight (C,1,3,3) -> (9, C) slab, bias -> (1, C); resident across B, H tiles.
    w9c = jnp.transpose(weight[:, 0, :, :], (1, 2, 0)).reshape(9, C)
    b1c = bias.reshape(1, C)

    # Explicit VMEM limit from the real footprint; fail loudly if impossible.
    blk = TH * W * TC * itemsize
    halo = 2 * W * TC * itemsize
    temps = 6 * TH * W * TC * 4                  # f32/compute intermediates
    footprint = 2 * (2 * blk + halo) + temps + 4 * 10 * TC * 4
    if footprint > 0.9 * vmem_cap:
        raise ValueError(
            f"dwconv_pallas: estimated VMEM footprint {footprint / 2**20:.1f} MiB "
            f"exceeds ~90% of VMEM capacity {vmem_cap / 2**20:.1f} MiB "
            f"(TH={TH}, TC={TC}, W={W}); shapes too large for this chip.")
    vmem_limit = int(min(max(int(footprint * 1.3), 32 * 1024 * 1024),
                         max(vmem_cap - 8 * 1024 * 1024, 32 * 1024 * 1024)))

    kernel = _make_dwconv_kernel(H, W, TH, compute_dtype)
    grid = (C // TC, B, H // TH)                 # channels outermost -> weight DMA reused

    out4 = pl.pallas_call(
        kernel,
        out_shape=jax.ShapeDtypeStruct((B, H, W, C), io_dtype),
        grid=grid,
        in_specs=[
            pl.BlockSpec((1, TH, W, TC), lambda c, b, h: (b, h, 0, c)),
            pl.BlockSpec((1, 1, W, TC),
                         lambda c, b, h: (b, jnp.maximum(h * TH - 1, 0), 0, c)),
            pl.BlockSpec((1, 1, W, TC),
                         lambda c, b, h: (b, jnp.minimum((h + 1) * TH, H - 1), 0, c)),
            pl.BlockSpec((9, TC), lambda c, b, h: (0, c)),
            pl.BlockSpec((1, TC), lambda c, b, h: (0, c)),
        ],
        out_specs=pl.BlockSpec((1, TH, W, TC), lambda c, b, h: (b, h, 0, c)),
        compiler_params=pltpu.CompilerParams(
            dimension_semantics=("parallel", "parallel", "parallel"),
            vmem_limit_bytes=vmem_limit),
    )(x4, x4, x4, w9c, b1c)

    return out4.reshape(B, N, C)


def dwconv_reference(x_bnc, weight, bias, H, W):
    """Pure-JAX reference mirroring the PyTorch forward (NCHW depthwise conv)."""
    B, N, C = x_bnc.shape
    x = jnp.transpose(x_bnc, (0, 2, 1)).reshape(B, C, H, W).astype(jnp.float32)
    out = jax.lax.conv_general_dilated(
        x, weight.astype(jnp.float32),
        window_strides=(1, 1),
        padding=((1, 1), (1, 1)),
        dimension_numbers=("NCHW", "OIHW", "NCHW"),
        feature_group_count=C,
    ) + bias.astype(jnp.float32).reshape(1, C, 1, 1)
    return jnp.transpose(out.reshape(B, C, H * W), (0, 2, 1)).astype(x_bnc.dtype)


# -------------- Block_dec forward (JAX wrapper around Pallas DWConv) --------------

def _layer_norm(x, gamma, beta, eps=1e-5):
    mu = jnp.mean(x, axis=-1, keepdims=True)
    var = jnp.mean(jnp.square(x - mu), axis=-1, keepdims=True)
    return (x - mu) * jax.lax.rsqrt(var + eps) * gamma + beta


def _attention(p, x, num_heads):
    # sr_ratio = 1 (Block_dec default), qkv_bias=False, dropouts = 0 -> identity.
    B, N, C = x.shape
    hd = C // num_heads
    scale = hd ** (-0.5)
    q = jnp.transpose((x @ p["q_w"].T).reshape(B, N, num_heads, hd), (0, 2, 1, 3))
    kv = jnp.transpose((x @ p["kv_w"].T).reshape(B, N, 2, num_heads, hd),
                       (2, 0, 3, 1, 4))
    k, v = kv[0], kv[1]
    attn = jnp.einsum("bhqd,bhkd->bhqk", q, k) * scale
    attn = jax.nn.softmax(attn, axis=-1)
    out = jnp.einsum("bhqk,bhkd->bhqd", attn, v)
    out = jnp.transpose(out, (0, 2, 1, 3)).reshape(B, N, C)
    return out @ p["proj_w"].T + p["proj_b"]


def _mlp(p, x, H, W, dwconv_fn):
    x = x @ p["fc1_w"].T + p["fc1_b"]
    x = dwconv_fn(x, p["dw_w"], p["dw_b"], H, W)
    x = jax.nn.gelu(x, approximate=False)
    return x @ p["fc2_w"].T + p["fc2_b"]


def block_dec_forward(p, x, H, W, num_heads, dwconv_fn=dwconv_pallas):
    # drop / drop_path = 0 -> identity (inference).
    x = x + _attention(p, _layer_norm(x, p["norm1_g"], p["norm1_b"]), num_heads)
    x = x + _mlp(p, _layer_norm(x, p["norm2_g"], p["norm2_b"]), H, W, dwconv_fn)
    return x


def init_block_params(key, dim, mlp_ratio=4.0):
    hidden = int(dim * mlp_ratio)
    ks = jax.random.split(key, 14)
    n = lambda k_, shape, s: s * jax.random.normal(k_, shape, jnp.float32)
    return dict(
        norm1_g=1.0 + n(ks[0], (dim,), 0.1), norm1_b=n(ks[1], (dim,), 0.1),
        norm2_g=1.0 + n(ks[2], (dim,), 0.1), norm2_b=n(ks[3], (dim,), 0.1),
        q_w=n(ks[4], (dim, dim), 0.05),
        kv_w=n(ks[5], (2 * dim, dim), 0.05),
        proj_w=n(ks[6], (dim, dim), 0.05), proj_b=n(ks[7], (dim,), 0.02),
        fc1_w=n(ks[8], (hidden, dim), 0.05), fc1_b=n(ks[9], (hidden,), 0.02),
        dw_w=n(ks[10], (hidden, 1, 3, 3), 0.2), dw_b=n(ks[11], (hidden,), 0.1),
        fc2_w=n(ks[12], (dim, hidden), 0.05), fc2_b=n(ks[13], (dim,), 0.02),
    )


if __name__ == "__main__":
    root = jax.random.PRNGKey(0)
    k_x1, k_w1, k_b1, k_x2, k_w2, k_b2, k_xb, k_p = jax.random.split(root, 8)

    # Small shapes consistent with Block_dec: dim=32, heads=4, mlp hidden=128,
    # H=W=8 (N=64), batch=2.
    B, H, W = 2, 8, 8
    dim, num_heads, mlp_ratio = 32, 4, 4.0
    hidden = int(dim * mlp_ratio)   # 128 -> lane-dense
    N = H * W

    # --- Check 1: DWConv Pallas kernel vs. XLA depthwise conv (aligned C) ---
    x1 = jax.random.normal(k_x1, (B, N, hidden), jnp.float32)
    w1 = 0.2 * jax.random.normal(k_w1, (hidden, 1, 3, 3), jnp.float32)
    b1 = 0.1 * jax.random.normal(k_b1, (hidden,), jnp.float32)
    ref1 = dwconv_reference(x1, w1, b1, H, W)
    out1 = jax.block_until_ready(dwconv_pallas(x1, w1, b1, H, W))
    assert out1.shape == (B, N, hidden)
    assert jnp.allclose(out1, ref1, atol=1e-5, rtol=1e-5), "dwconv mismatch (single tile)"
    # Force multiple row tiles so the 1-row halo path is exercised.
    out1b = jax.block_until_ready(dwconv_pallas(x1, w1, b1, H, W, max_rows_per_tile=2))
    assert jnp.allclose(out1b, ref1, atol=1e-5, rtol=1e-5), "dwconv mismatch (row-tiled)"

    # --- Check 2: non-square spatial + C not a multiple of 128 (full-C block) ---
    H2, W2, C2 = 4, 8, 72
    x2 = jax.random.normal(k_x2, (1, H2 * W2, C2), jnp.float32)
    w2 = 0.2 * jax.random.normal(k_w2, (C2, 1, 3, 3), jnp.float32)
    b2 = 0.1 * jax.random.normal(k_b2, (C2,), jnp.float32)
    out2 = jax.block_until_ready(dwconv_pallas(x2, w2, b2, H2, W2, max_rows_per_tile=2))
    ref2 = dwconv_reference(x2, w2, b2, H2, W2)
    assert jnp.allclose(out2, ref2, atol=1e-5, rtol=1e-5), "dwconv mismatch (C!=128k)"

    # --- Check 3: bf16 I/O (bf16 tap math, f32 accumulate) ---
    x1b = x1.astype(jnp.bfloat16)
    out_bf = jax.block_until_ready(
        dwconv_pallas(x1b, w1, b1, H, W, max_rows_per_tile=4)).astype(jnp.float32)
    ref_bf = dwconv_reference(x1b.astype(jnp.float32), w1, b1, H, W)
    assert jnp.allclose(out_bf, ref_bf, atol=5e-2, rtol=5e-2), "dwconv mismatch (bf16)"

    # --- Check 4: full Block_dec forward, Pallas dwconv vs. reference dwconv ---
    params = init_block_params(k_p, dim, mlp_ratio)
    xb = jax.random.normal(k_xb, (B, N, dim), jnp.float32)
    y_pallas = jax.block_until_ready(
        block_dec_forward(params, xb, H, W, num_heads, dwconv_fn=dwconv_pallas))
    y_ref = block_dec_forward(params, xb, H, W, num_heads, dwconv_fn=dwconv_reference)
    assert y_pallas.shape == (B, N, dim)
    assert jnp.allclose(y_pallas, y_ref, atol=1e-4, rtol=1e-4), "Block_dec mismatch"

    print("KERNEL_OK")
</pallas_src>

<mosaic_0001>
module attributes {stable_mosaic.version = 11 : i64} {
  func.func @kernel(%arg0: i32, %arg1: i32, %arg2: i32, %arg3: memref<1x8x8x128xf32, #tpu.memory_space<vmem>>, %arg4: memref<1x1x8x128xf32, #tpu.memory_space<vmem>>, %arg5: memref<1x1x8x128xf32, #tpu.memory_space<vmem>>, %arg6: memref<9x128xf32, #tpu.memory_space<vmem>>, %arg7: memref<1x128xf32, #tpu.memory_space<vmem>>, %arg8: memref<1x8x8x128xf32, #tpu.memory_space<vmem>>) attributes {dimension_semantics = [#tpu.dimension_semantics<parallel>, #tpu.dimension_semantics<parallel>, #tpu.dimension_semantics<parallel>], iteration_bounds = array<i64: 1, 2, 1>, scalar_prefetch = 0 : i64, scratch_operands = 0 : i64, tpu.core_type = #tpu.core_type<tc>, window_params = [{transform_indices = @transform_0, window_bounds = array<i64: 1, 8, 8, 128>}, {transform_indices = @transform_1, window_bounds = array<i64: 1, 1, 8, 128>}, {transform_indices = @transform_2, window_bounds = array<i64: 1, 1, 8, 128>}, {transform_indices = @transform_3, window_bounds = array<i64: 9, 128>}, {transform_indices = @transform_4, window_bounds = array<i64: 1, 128>}, {transform_indices = @transform_5, window_bounds = array<i64: 1, 8, 8, 128>}]} {
    %c0 = arith.constant 0 : index
    %c0_0 = arith.constant 0 : index
    %c0_1 = arith.constant 0 : index
    %c0_2 = arith.constant 0 : index
    %0 = vector.load %arg3[%c0, %c0_0, %c0_1, %c0_2] : memref<1x8x8x128xf32, #tpu.memory_space<vmem>>, vector<1x8x8x128xf32>
    %1 = vector.shape_cast %0 : vector<1x8x8x128xf32> to vector<8x8x128xf32>
    %c0_3 = arith.constant 0 : index
    %c0_4 = arith.constant 0 : index
    %c0_5 = arith.constant 0 : index
    %c0_6 = arith.constant 0 : index
    %2 = vector.load %arg4[%c0_3, %c0_4, %c0_5, %c0_6] : memref<1x1x8x128xf32, #tpu.memory_space<vmem>>, vector<1x1x8x128xf32>
    %3 = vector.shape_cast %2 : vector<1x1x8x128xf32> to vector<1x8x128xf32>
    %c0_7 = arith.constant 0 : index
    %c0_8 = arith.constant 0 : index
    %c0_9 = arith.constant 0 : index
    %c0_10 = arith.constant 0 : index
    %4 = vector.load %arg5[%c0_7, %c0_8, %c0_9, %c0_10] : memref<1x1x8x128xf32, #tpu.memory_space<vmem>>, vector<1x1x8x128xf32>
    %5 = vector.shape_cast %4 : vector<1x1x8x128xf32> to vector<1x8x128xf32>
    %c0_11 = arith.constant 0 : index
    %c0_12 = arith.constant 0 : index
    %6 = vector.load %arg6[%c0_11, %c0_12] : memref<9x128xf32, #tpu.memory_space<vmem>>, vector<9x128xf32>
    %7 = vector.extract_strided_slice %1 {offsets = [0, 0, 0], sizes = [7, 8, 128], strides = [1, 1, 1]} : vector<8x8x128xf32> to vector<7x8x128xf32>
    %8 = tpu.concatenate %3, %7 in 0 : vector<1x8x128xf32>, vector<7x8x128xf32> -> vector<8x8x128xf32>
    %9 = vector.extract_strided_slice %1 {offsets = [1, 0, 0], sizes = [7, 8, 128], strides = [1, 1, 1]} : vector<8x8x128xf32> to vector<7x8x128xf32>
    %10 = tpu.concatenate %9, %5 in 0 : vector<7x8x128xf32>, vector<1x8x128xf32> -> vector<8x8x128xf32>
    %11 = tpu.iota {dimensions = array<i32: 0>} : vector<8x1x1xi32>
    %c8_i32 = arith.constant 8 : i32
    %12 = arith.muli %arg2, %c8_i32 : i32
    %13 = vector.broadcast %12 : i32 to vector<8x1x1xi32>
    %14 = arith.addi %11, %13 : vector<8x1x1xi32>
    %c1_i32 = arith.constant 1 : i32
    %15 = vector.broadcast %c1_i32 : i32 to vector<8x1x1xi32>
    %16 = arith.cmpi sge, %14, %15 : vector<8x1x1xi32>
    %17 = arith.extui %16 : vector<8x1x1xi1> to vector<8x1x1xi32>
    %18 = arith.sitofp %17 : vector<8x1x1xi32> to vector<8x1x1xf32>
    %c6_i32 = arith.constant 6 : i32
    %19 = vector.broadcast %c6_i32 : i32 to vector<8x1x1xi32>
    %20 = arith.cmpi sle, %14, %19 : vector<8x1x1xi32>
    %21 = arith.extui %20 : vector<8x1x1xi1> to vector<8x1x1xi32>
    %22 = arith.sitofp %21 : vector<8x1x1xi32> to vector<8x1x1xf32>
    %23 = tpu.iota {dimensions = array<i32: 1>} : vector<1x8x1xi32>
    %c1_i32_13 = arith.constant 1 : i32
    %24 = vector.broadcast %c1_i32_13 : i32 to vector<1x8x1xi32>
    %25 = arith.cmpi sge, %23, %24 : vector<1x8x1xi32>
    %26 = arith.extui %25 : vector<1x8x1xi1> to vector<1x8x1xi32>
    %27 = arith.sitofp %26 : vector<1x8x1xi32> to vector<1x8x1xf32>
    %c6_i32_14 = arith.constant 6 : i32
    %28 = vector.broadcast %c6_i32_14 : i32 to vector<1x8x1xi32>
    %29 = arith.cmpi sle, %23, %28 : vector<1x8x1xi32>
    %30 = arith.extui %29 : vector<1x8x1xi1> to vector<1x8x1xi32>
    %31 = arith.sitofp %30 : vector<1x8x1xi32> to vector<1x8x1xf32>
    %32 = vector.extract_strided_slice %6 {offsets = [4, 0], sizes = [1, 128], strides = [1, 1]} : vector<9x128xf32> to vector<1x128xf32>
    %33 = vector.shape_cast %32 : vector<1x128xf32> to vector<128xf32>
    %34 = vector.shape_cast %33 : vector<128xf32> to vector<1x1x128xf32>
    %35 = vector.broadcast %34 : vector<1x1x128xf32> to vector<8x8x128xf32>
    %36 = arith.mulf %1, %35 : vector<8x8x128xf32>
    %c1_i32_15 = arith.constant 1 : i32
    %37 = tpu.dynamic_rotate %8 by %c1_i32_15 dim 1 : vector<8x8x128xf32>, i32 -> vector<8x8x128xf32>
    %38 = vector.broadcast %27 : vector<1x8x1xf32> to vector<8x8x128xf32>
    %39 = arith.mulf %37, %38 : vector<8x8x128xf32>
    %40 = vector.broadcast %18 : vector<8x1x1xf32> to vector<8x8x128xf32>
    %41 = arith.mulf %39, %40 : vector<8x8x128xf32>
    %42 = vector.extract_strided_slice %6 {offsets = [0, 0], sizes = [1, 128], strides = [1, 1]} : vector<9x128xf32> to vector<1x128xf32>
    %43 = vector.shape_cast %42 : vector<1x128xf32> to vector<128xf32>
    %44 = vector.shape_cast %43 : vector<128xf32> to vector<1x1x128xf32>
    %45 = vector.broadcast %44 : vector<1x1x128xf32> to vector<8x8x128xf32>
    %46 = arith.mulf %41, %45 : vector<8x8x128xf32>
    %47 = arith.addf %36, %46 : vector<8x8x128xf32>
    %48 = vector.broadcast %18 : vector<8x1x1xf32> to vector<8x8x128xf32>
    %49 = arith.mulf %8, %48 : vector<8x8x128xf32>
    %50 = vector.extract_strided_slice %6 {offsets = [1, 0], sizes = [1, 128], strides = [1, 1]} : vector<9x128xf32> to vector<1x128xf32>
    %51 = vector.shape_cast %50 : vector<1x128xf32> to vector<128xf32>
    %52 = vector.shape_cast %51 : vector<128xf32> to vector<1x1x128xf32>
    %53 = vector.broadcast %52 : vector<1x1x128xf32> to vector<8x8x128xf32>
    %54 = arith.mulf %49, %53 : vector<8x8x128xf32>
    %55 = arith.addf %47, %54 : vector<8x8x128xf32>
    %c7_i32 = arith.constant 7 : i32
    %56 = tpu.dynamic_rotate %8 by %c7_i32 dim 1 : vector<8x8x128xf32>, i32 -> vector<8x8x128xf32>
    %57 = vector.broadcast %31 : vector<1x8x1xf32> to vector<8x8x128xf32>
    %58 = arith.mulf %56, %57 : vector<8x8x128xf32>
    %59 = vector.broadcast %18 : vector<8x1x1xf32> to vector<8x8x128xf32>
    %60 = arith.mulf %58, %59 : vector<8x8x128xf32>
    %61 = vector.extract_strided_slice %6 {offsets = [2, 0], sizes = [1, 128], strides = [1, 1]} : vector<9x128xf32> to vector<1x128xf32>
    %62 = vector.shape_cast %61 : vector<1x128xf32> to vector<128xf32>
    %63 = vector.shape_cast %62 : vector<128xf32> to vector<1x1x128xf32>
    %64 = vector.broadcast %63 : vector<1x1x128xf32> to vector<8x8x128xf32>
    %65 = arith.mulf %60, %64 : vector<8x8x128xf32>
    %66 = arith.addf %55, %65 : vector<8x8x128xf32>
    %c1_i32_16 = arith.constant 1 : i32
    %67 = tpu.dynamic_rotate %1 by %c1_i32_16 dim 1 : vector<8x8x128xf32>, i32 -> vector<8x8x128xf32>
    %68 = vector.broadcast %27 : vector<1x8x1xf32> to vector<8x8x128xf32>
    %69 = arith.mulf %67, %68 : vector<8x8x128xf32>
    %70 = vector.extract_strided_slice %6 {offsets = [3, 0], sizes = [1, 128], strides = [1, 1]} : vector<9x128xf32> to vector<1x128xf32>
    %71 = vector.shape_cast %70 : vector<1x128xf32> to vector<128xf32>
    %72 = vector.shape_cast %71 : vector<128xf32> to vector<1x1x128xf32>
    %73 = vector.broadcast %72 : vector<1x1x128xf32> to vector<8x8x128xf32>
    %74 = arith.mulf %69, %73 : vector<8x8x128xf32>
    %75 = arith.addf %66, %74 : vector<8x8x128xf32>
    %c7_i32_17 = arith.constant 7 : i32
    %76 = tpu.dynamic_rotate %1 by %c7_i32_17 dim 1 : vector<8x8x128xf32>, i32 -> vector<8x8x128xf32>
    %77 = vector.broadcast %31 : vector<1x8x1xf32> to vector<8x8x128xf32>
    %78 = arith.mulf %76, %77 : vector<8x8x128xf32>
    %79 = vector.extract_strided_slice %6 {offsets = [5, 0], sizes = [1, 128], strides = [1, 1]} : vector<9x128xf32> to vector<1x128xf32>
    %80 = vector.shape_cast %79 : vector<1x128xf32> to vector<128xf32>
    %81 = vector.shape_cast %80 : vector<128xf32> to vector<1x1x128xf32>
    %82 = vector.broadcast %81 : vector<1x1x128xf32> to vector<8x8x128xf32>
    %83 = arith.mulf %78, %82 : vector<8x8x128xf32>
    %84 = arith.addf %75, %83 : vector<8x8x128xf32>
    %c1_i32_18 = arith.constant 1 : i32
    %85 = tpu.dynamic_rotate %10 by %c1_i32_18 dim 1 : vector<8x8x128xf32>, i32 -> vector<8x8x128xf32>
    %86 = vector.broadcast %27 : vector<1x8x1xf32> to vector<8x8x128xf32>
    %87 = arith.mulf %85, %86 : vector<8x8x128xf32>
    %88 = vector.broadcast %22 : vector<8x1x1xf32> to vector<8x8x128xf32>
    %89 = arith.mulf %87, %88 : vector<8x8x128xf32>
    %90 = vector.extract_strided_slice %6 {offsets = [6, 0], sizes = [1, 128], strides = [1, 1]} : vector<9x128xf32> to vector<1x128xf32>
    %91 = vector.shape_cast %90 : vector<1x128xf32> to vector<128xf32>
    %92 = vector.shape_cast %91 : vector<128xf32> to vector<1x1x128xf32>
    %93 = vector.broadcast %92 : vector<1x1x128xf32> to vector<8x8x128xf32>
    %94 = arith.mulf %89, %93 : vector<8x8x128xf32>
    %95 = arith.addf %84, %94 : vector<8x8x128xf32>
    %96 = vector.broadcast %22 : vector<8x1x1xf32> to vector<8x8x128xf32>
    %97 = arith.mulf %10, %96 : vector<8x8x128xf32>
    %98 = vector.extract_strided_slice %6 {offsets = [7, 0], sizes = [1, 128], strides = [1, 1]} : vector<9x128xf32> to vector<1x128xf32>
    %99 = vector.shape_cast %98 : vector<1x128xf32> to vector<128xf32>
    %100 = vector.shape_cast %99 : vector<128xf32> to vector<1x1x128xf32>
    %101 = vector.broadcast %100 : vector<1x1x128xf32> to vector<8x8x128xf32>
    %102 = arith.mulf %97, %101 : vector<8x8x128xf32>
    %103 = arith.addf %95, %102 : vector<8x8x128xf32>
    %c7_i32_19 = arith.constant 7 : i32
    %104 = tpu.dynamic_rotate %10 by %c7_i32_19 dim 1 : vector<8x8x128xf32>, i32 -> vector<8x8x128xf32>
    %105 = vector.broadcast %31 : vector<1x8x1xf32> to vector<8x8x128xf32>
    %106 = arith.mulf %104, %105 : vector<8x8x128xf32>
    %107 = vector.broadcast %22 : vector<8x1x1xf32> to vector<8x8x128xf32>
    %108 = arith.mulf %106, %107 : vector<8x8x128xf32>
    %109 = vector.extract_strided_slice %6 {offsets = [8, 0], sizes = [1, 128], strides = [1, 1]} : vector<9x128xf32> to vector<1x128xf32>
    %110 = vector.shape_cast %109 : vector<1x128xf32> to vector<128xf32>
    %111 = vector.shape_cast %110 : vector<128xf32> to vector<1x1x128xf32>
    %112 = vector.broadcast %111 : vector<1x1x128xf32> to vector<8x8x128xf32>
    %113 = arith.mulf %108, %112 : vector<8x8x128xf32>
    %114 = arith.addf %103, %113 : vector<8x8x128xf32>
    %c0_20 = arith.constant 0 : index
    %c0_21 = arith.constant 0 : index
    %115 = vector.load %arg7[%c0_20, %c0_21] : memref<1x128xf32, #tpu.memory_space<vmem>>, vector<1x128xf32>
    %116 = vector.shape_cast %115 : vector<1x128xf32> to vector<1x1x128xf32>
    %117 = vector.broadcast %116 : vector<1x1x128xf32> to vector<8x8x128xf32>
    %118 = arith.addf %114, %117 : vector<8x8x128xf32>
    %c0_22 = arith.constant 0 : index
    %c0_23 = arith.constant 0 : index
    %c0_24 = arith.constant 0 : index
    %c0_25 = arith.constant 0 : index
    %119 = vector.load %arg8[%c0_22, %c0_23, %c0_24, %c0_25] : memref<1x8x8x128xf32, #tpu.memory_space<vmem>>, vector<1x8x8x128xf32>
    %120 = vector.shape_cast %119 : vector<1x8x8x128xf32> to vector<8x8x128xf32>
    %121 = vector.shape_cast %118 : vector<8x8x128xf32> to vector<1x8x8x128xf32>
    tpu.vector_store %arg8[%c0_22, %c0_23, %c0_24, %c0_25], %121 {strides = array<i32>} : memref<1x8x8x128xf32, #tpu.memory_space<vmem>>, vector<1x8x8x128xf32>,
    return
  }
  func.func @transform_0(%arg0: i32, %arg1: i32, %arg2: i32) -> (i32, i32, i32, i32) {
    %c0_i32 = arith.constant 0 : i32
    %c0_i32_0 = arith.constant 0 : i32
    return %arg1, %arg2, %c0_i32, %arg0 : i32, i32, i32, i32
  }
  func.func @transform_1(%arg0: i32, %arg1: i32, %arg2: i32) -> (i32, i32, i32, i32) {
    %c8_i32 = arith.constant 8 : i32
    %0 = arith.muli %arg2, %c8_i32 : i32
    %c1_i32 = arith.constant 1 : i32
    %1 = arith.subi %0, %c1_i32 : i32
    %c0_i32 = arith.constant 0 : i32
    %2 = arith.maxsi %1, %c0_i32 : i32
    %c0_i32_0 = arith.constant 0 : i32
    %c0_i32_1 = arith.constant 0 : i32
    return %arg1, %2, %c0_i32_0, %arg0 : i32, i32, i32, i32
  }
  func.func @transform_2(%arg0: i32, %arg1: i32, %arg2: i32) -> (i32, i32, i32, i32) {
    %c1_i32 = arith.constant 1 : i32
    %0 = arith.addi %arg2, %c1_i32 : i32
    %c8_i32 = arith.constant 8 : i32
    %1 = arith.muli %0, %c8_i32 : i32
    %c7_i32 = arith.constant 7 : i32
    %2 = arith.minsi %1, %c7_i32 : i32
    %c0_i32 = arith.constant 0 : i32
    %c0_i32_0 = arith.constant 0 : i32
    return %arg1, %2, %c0_i32, %arg0 : i32, i32, i32, i32
  }
  func.func @transform_3(%arg0: i32, %arg1: i32, %arg2: i32) -> (i32, i32) {
    %c0_i32 = arith.constant 0 : i32
    %c0_i32_0 = arith.constant 0 : i32
    return %c0_i32, %arg0 : i32, i32
  }
  func.func @transform_4(%arg0: i32, %arg1: i32, %arg2: i32) -> (i32, i32) {
    %c0_i32 = arith.constant 0 : i32
    %c0_i32_0 = arith.constant 0 : i32
    return %c0_i32, %arg0 : i32, i32
  }
  func.func @transform_5(%arg0: i32, %arg1: i32, %arg2: i32) -> (i32, i32, i32, i32) {
    %c0_i32 = arith.constant 0 : i32
    %c0_i32_0 = arith.constant 0 : i32
    return %arg1, %arg2, %c0_i32, %arg0 : i32, i32, i32, i32
  }
}

</mosaic_0001>

<bundles_post_ra>
// kernel: tpu_custom_call.1
= control target key start
LH: loop header
LB: loop body
LE: loop exit
PB: predicated region body
PF: predicated region fallthrough
CT: control target
= control target key end

     0   :  { %s1831_s0 = inlined_call_operand.hbm [shape: f32[2,8,8,128], index: 0, kind: input, shape index: {}]   ;;  %s1832_s1 = inlined_call_operand.hbm [shape: f32[2,8,8,128], index: 1, kind: input, shape index: {}]   ;;  %s1833_s2 = inlined_call_operand.hbm [shape: f32[2,8,8,128], index: 2, kind: input, shape index: {}]   ;;  %s1834_s3 = inlined_call_operand.hbm [shape: f32[9,128], index: 3, kind: input, shape index: {}]   ;;  %s1835_s4 = inlined_call_operand.vmem [shape: f32[1,128], index: 4, kind: input, shape index: {}]   ;;  %s1836_s5 = inlined_call_operand.hbm [shape: f32[2,8,8,128], index: 5, kind: output, shape index: {}]  }
   0x1   :  { %1854 = sst [smem:[#allocation22_spill]] %s1832_s1 }
   0x2   :  { %10 = vsyncpa [#allocation3], 0 }
   0x3   :  { %12 = vsyncpa [#allocation3 + $0x1], 0 }
   0x4   :  { %13 = vsyncpa [#allocation6], 0 }
   0x5   :  { %15 = vsyncpa [#allocation6 + $0x1], 0 }
   0x6   :  { %16 = vsyncpa [#allocation9], 0 }
   0x7   :  { %17 = vsyncpa [#allocation4], 0 }
   0x8   :  { %19 = vsyncpa [#allocation4 + $0x1], 0  ;;  %s1344_s18 = smov 0   ;;  %s1346_s19 = smov 0  }
   0x9   :  { %s1348_s20 = smov 0   ;;  %s1350_s21 = smov 0  }
   0xa   :  { %s1352_s22 = smov 0   ;;  %s1354_s23 = smov 0  }
   0xb LB: > { %1855 = sst [smem:[#allocation15_spill]] %s1282_s18  ;;  %s40_s24 = sadd.s32 1, %s1298_s22  ;;  %s1302_s23 = sphi %s1354_s23, %s25_s23   ;;  %s1298_s22 = sphi %s1352_s22, %s1889_s22   ;;  %s1294_s21 = sphi %s1350_s21, %s1888_s21   ;;  %s1290_s20 = sphi %s1348_s20, %s1887_s20   ;;  %s1286_s19 = sphi %s1346_s19, %s1891_s19   ;;  %s1282_s18 = sphi %s1344_s18, %s1890_s18  }
   0xc   : > { %1856 = sst [smem:[#allocation16_spill]] %s1290_s20  ;;  %s55_s25 = sadd.s32 1, %s1290_s20 }
   0xd   : > { %1857 = sst [smem:[#allocation17_spill]] %s1298_s22  ;;  %p42_p0 = scmp.ge.s32.totalorder %s40_s24, 2 }
   0xe   : > { %1858 = sst [smem:[#allocation18_spill]] %s1302_s23  ;;  %p1837_p1 = scmp.ne.s32.totalorder %s1290_s20, %s1286_s19 }
   0xf   : > { %p63_p2 = scmp.eq.s32.totalorder %s1302_s23, 0  ;;  %s1893_s24 = smov (%p42_p0, %s40_s24), 0 }
  0x10   : > { %1859 = sst [smem:[#allocation19_spill]] %s1893_s24  ;;  %p1037_p5 = scmp.lt.s32.totalorder %s1302_s23, 2 }
  0x11   : > { %p64_p4 = por %p63_p2, %p1837_p1  ;;  %s48_s26 = ssub.s32 %s1298_s22, %s1893_s24 }
  0x12   : > { %s1389_s27 = sand.u32 1, %s1290_s20   ;;  %p53_p6 = scmp.eq.s32.totalorder %s48_s26, 0 }
  0x13   : > { %s1392_s28 = sshll.u32 %s1298_s22, 10  ;;  %p1400_p7 = pnand %p1037_p5, %p64_p4 }
  0x14   : > { %s1398_s6 = scalar_lea.hbm %s1831_s0, %s1392_s28  ;;  %s295_s9 = sand.u32 1, %s1302_s23  }
  0x15   : > { %s1860_s7 = scalar_select %p1400_p7, 1, 0 }
  0x16   : > { %s1405_s8 = scalar_select %p53_p6, %s1290_s20, %s55_s25  }
  0x17   : > { %s1838_s10 = sshll.u32 %s1389_s27, 3  ;;  %s1862_s1 = sld [smem:[#allocation22_spill]] }
  0x18   : > { %1861 = sst [smem:[#allocation20_spill]] %s1405_s8  ;;  %s299_s14 = scalar_lea.vmem [#allocation5], %s1838_s10 }
  0x19   : > { %s313_s15 = sshll.u32 %s299_s14, 4  ;;  %s1419_s16 = scalar_lea.sflag [#allocation6], %s295_s9  ;;  %s1417_s15 = int_to_ptr.vmem [resolvable:$true] %s313_s15 }
  0x1a   : > { %p1425_p9 = pneg %p1400_p7 }
  0x1c   : > { %s1863_s25 = scalar_select %p1425_p9, 1, 0 }
  0x1d   : > { %s1413_s13 = scalar_lea.hbm %s1862_s1, %s1392_s28  ;;  %s1099_s30 = scalar_lea.hbm %s1862_s1, 2048 }
  0x1e   : > { %s1094_s17 = scalar_lea.hbm %s1413_s13, 128  ;;  %p1100_p12 = scmp.lt.u32.totalorder %s1413_s13, %s1862_s1 }
  0x1f   : > { %p1095_p8 = scmp.ne.s32.totalorder %s1413_s13, %s1094_s17  ;;  %p1101_p13 = scmp.lt.u32.totalorder %s1099_s30, %s1094_s17 }
  0x20   : > { %p1103_p2 = scmp.lt.u32.totalorder %s1094_s17, %s1413_s13 }
  0x21   : > { %p1097_p10 = pnand %p1425_p9, %p1095_p8  ;;  %p1102_p0 = por %p1101_p13, %p1100_p12 }
  0x23   : > { %p1098_p11 = pneg %p1097_p10  ;;  %p1104_p4 = por %p1103_p2, %p1102_p0 }
  0x25   : > { %p1105_p5 = pnand %p1104_p4, %p1098_p11 }
  0x27   : > { %1108 = shalt.err (!%p1105_p5)
}
  0x28   : > { %s1109_s9 = scalar_lea.vmem %s1417_s15, 128  ;;  %s1304_s14 = smov [#allocation5]  }
  0x29   : > { %p1110_p6 = scmp.ne.s32.totalorder %s1417_s15, %s1109_s9  ;;  %s1114_s26 = sshll.u32 %s1304_s14, 4  ;;  %s1115_s26 = int_to_ptr.vmem [resolvable:$false] %s1114_s26 }
  0x2a   : > { %s1116_s29 = scalar_lea.vmem %s1115_s26, 256  ;;  %p1117_p3 = scmp.lt.s32.totalorder %s1417_s15, %s1115_s26 }
  0x2b   : > { %p1112_p8 = pnand %p1110_p6, %p1425_p9  ;;  %p1118_p1 = scmp.lt.s32.totalorder %s1116_s29, %s1109_s9 }
  0x2d   : > { %p1113_p10 = pneg %p1112_p8  ;;  %p1119_p12 = por %p1118_p1, %p1117_p3 }
  0x2f   : > { %p1120_p13 = pnand %p1119_p12, %p1113_p10 }
  0x31   : > { %1123 = shalt.err (!%p1120_p13)
}
  0x32   : > { %1028 = dma.hbm_to_vmem [thread:$0]  (!%p1400_p7), %s1413_s13, 128, %s1417_s15, %s1419_s16  }
  0x33   : > { %s1450_s17 = sadd.s32 4294967295, %s1302_s23   ;;  %s971_s30 = sadd.s32 4294967294, %s1302_s23  }
  0x34   : > { %p68_p1 = scmp.ne.s32.totalorder %s1286_s19, %s1282_s18  ;;  %p1845_p3 = scmp.eq.s32.totalorder %s1450_s17, 0 }
  0x35   : > { %p224_p11 = scmp.eq.s32.totalorder %s1450_s17, 1  ;;  %p230_p0 = scmp.eq.s32.totalorder %s971_s30, 1 }
  0x36   : > { %p972_p2 = scmp.ge.s32.totalorder %s1302_s23, 1  ;;  %p1460_p4 = por %p1845_p3, %p68_p1 }
  0x37   : > { %p1865_p5 = scmp.ne.s32.totalorder %s1290_s20, %s1286_s19  ;;  %p1471_p8 = por %p230_p0, %p68_p1 }
  0x38   : > { %s1864_s11 = scalar_select %p1460_p4, 1, 0 }
  0x39   : > { %p1467_p6 = por %p224_p11, %p1865_p5  ;;  %p237_p10 = scmp.lt.s32.totalorder %s1302_s23, 3 }
  0x3a   : > { %s1867_s15 = scalar_select %p1471_p8, 1, 0 }
  0x3b   : > { %s1866_s13 = scalar_select %p1467_p6, 1, 0 }
  0x3c   : > { %1868 = sst [smem:[#allocation21_spill]] %s1867_s15  ;;  %p1476_p12 = pnand %p972_p2, %p237_p10 }
  0x3d   : > { %s1305_s9 = smov [#allocation8]   ;;  %s976_s26 = sshll.u32 %s1389_s27, 6 }
  0x3e   : > { %s1869_s12 = scalar_select %p1476_p12, 1, 0 }
  0x3f   : > { %s251_s14 = sshll.u32 %s1305_s9, 4  ;;  %p1018_p13 = pneg %p1476_p12  ;;  %s1480_s14 = int_to_ptr.vmem [resolvable:$true] %s251_s14 }
  0x40   : > { %s275_s30 = scalar_lea.vmem [#allocation2], %s976_s26  ;;  %s1124_s9 = scalar_lea.hbm %s1834_s3, 256 }
  0x41   : > { %p1487_p11 = pnand %p1018_p13, %p1845_p3  ;;  %s285_s10 = sshll.u32 %s275_s30, 4  ;;  %s1492_s10 = int_to_ptr.vmem [resolvable:$true] %s285_s10 }
  0x42   : > { %p1125_p1 = scmp.ne.s32.totalorder %s1834_s3, %s1124_s9  ;;  %p1131_p10 = scmp.lt.u32.totalorder %s1124_s9, %s1834_s3 }
  0x43   : > { %p1126_p0 = pneg %p1487_p11 }
  0x45   : > { %p1127_p2 = pnand %p1126_p0, %p1125_p1 }
  0x47   : > { %p1128_p5 = pneg %p1127_p2 }
  0x49   : > { %p1133_p13 = pnand %p1131_p10, %p1128_p5 }
  0x4b   : > { %1136 = shalt.err (!%p1133_p13)
}
  0x4c   : > { %s1137_s26 = scalar_lea.vmem %s1480_s14, 256  ;;  %p1145_p4 = scmp.lt.s32.totalorder %s1480_s14, %s1480_s14 }
  0x4d   : > { %p1138_p3 = scmp.ne.s32.totalorder %s1480_s14, %s1137_s26  ;;  %p1146_p12 = scmp.lt.s32.totalorder %s1137_s26, %s1137_s26 }
  0x4f   : > { %p1140_p8 = pnand %p1138_p3, %p1126_p0  ;;  %p1147_p7 = por %p1146_p12, %p1145_p4 }
  0x51   : > { %p1141_p6 = pneg %p1140_p8 }
  0x53   : > { %p1148_p9 = pnand %p1147_p7, %p1141_p6 }
  0x55   : > { %1151 = shalt.err (!%p1148_p9)
}
  0x56   : > { %s1306_s20 = smov 128   ;;  %s1307_s22 = smov 8  }
  0x57   : > { %1021 = dma.hbm_to_vmem [thread:$0]  (!%p1487_p11), %s1834_s3, 256, %s1480_s14, [#allocation9], %s1306_s20, %s1306_s20, %s1307_s22  }
  0x58   : > { %s272_s8 = scalar_lea.sflag [#allocation3], %s1389_s27  ;;  %s1152_s15 = scalar_lea.hbm %s1398_s6, 1024 }
  0x59   : > { %p1153_p7 = scmp.ne.s32.totalorder %s1398_s6, %s1152_s15  ;;  %p1871_p9 = scmp.ne.s32.totalorder %s1863_s25, 0 }
  0x5a   : > { %s1157_s26 = scalar_lea.hbm %s1831_s0, 2048  ;;  %p1158_p6 = scmp.lt.u32.totalorder %s1398_s6, %s1831_s0 }
  0x5b   : > { %p1155_p3 = pnand %p1153_p7, %p1871_p9  ;;  %p1159_p8 = scmp.lt.u32.totalorder %s1157_s26, %s1152_s15 }
  0x5c   : > { %p1161_p1 = scmp.lt.u32.totalorder %s1152_s15, %s1398_s6 }
  0x5d   : > { %p1156_p4 = pneg %p1155_p3  ;;  %p1160_p12 = por %p1159_p8, %p1158_p6 }
  0x5f   : > { %p1162_p0 = por %p1161_p1, %p1160_p12 }
  0x61   : > { %p1163_p2 = pnand %p1162_p0, %p1156_p4 }
  0x63   : > { %1166 = shalt.err (!%p1163_p2)
}
  0x64   : > { %s1167_s14 = scalar_lea.vmem %s1492_s10, 1024  ;;  %s1308_s29 = smov [#allocation2]  }
  0x65   : > { %p1168_p11 = scmp.ne.s32.totalorder %s1492_s10, %s1167_s14  ;;  %s1172_s23 = sshll.u32 %s1308_s29, 4  ;;  %s1173_s23 = int_to_ptr.vmem [resolvable:$false] %s1172_s23 }
  0x66   : > { %s1174_s1 = scalar_lea.vmem %s1173_s23, 2048  ;;  %p1175_p13 = scmp.lt.s32.totalorder %s1492_s10, %s1173_s23 }
  0x67   : > { %p1170_p5 = pnand %p1168_p11, %p1871_p9  ;;  %p1176_p7 = scmp.lt.s32.totalorder %s1174_s1, %s1167_s14 }
  0x69   : > { %p1171_p10 = pneg %p1170_p5  ;;  %p1177_p3 = por %p1176_p7, %p1175_p13 }
  0x6b   : > { %p1178_p6 = pnand %p1177_p3, %p1171_p10 }
  0x6d   : > { %1181 = shalt.err (!%p1178_p6)
}
  0x6e   : > { %p1872_p4 = scmp.ne.s32.totalorder %s1860_s7, 0  ;;  %s1873_s18 = sadd.s32 896, %s1392_s28 }
  0x6f   : > { %s1550_s30 = scalar_lea.hbm %s1833_s2, %s1873_s18  ;;  %s1874_s9 = sshll.u32 %s1389_s27, 3 }
  0x70   : > { %1025 = dma.hbm_to_vmem [thread:$0]  (!%p1872_p4), %s1398_s6, 1024, %s1492_s10, %s272_s8, %s1306_s20, %s1306_s20, %s1307_s22  }
  0x71   : > { %s324_s26 = scalar_lea.vmem [#allocation7], %s1874_s9  ;;  %s1182_s29 = scalar_lea.hbm %s1550_s30, 128 }
  0x72   : > { %s338_s14 = sshll.u32 %s324_s26, 4  ;;  %p1183_p8 = scmp.ne.s32.totalorder %s1550_s30, %s1182_s29  ;;  %s339_s14 = int_to_ptr.vmem [resolvable:$true] %s338_s14 }
  0x73   : > { %s1187_s10 = scalar_lea.hbm %s1833_s2, 2048  ;;  %p1188_p0 = scmp.lt.u32.totalorder %s1550_s30, %s1833_s2 }
  0x74   : > { %p1185_p12 = pnand %p1183_p8, %p1871_p9  ;;  %p1189_p2 = scmp.lt.u32.totalorder %s1187_s10, %s1182_s29 }
  0x75   : > { %p1191_p5 = scmp.lt.u32.totalorder %s1182_s29, %s1550_s30 }
  0x76   : > { %p1186_p1 = pneg %p1185_p12  ;;  %p1190_p11 = por %p1189_p2, %p1188_p0 }
  0x78   : > { %p1192_p10 = por %p1191_p5, %p1190_p11 }
  0x7a   : > { %p1193_p13 = pnand %p1192_p10, %p1186_p1 }
  0x7c   : > { %1196 = shalt.err (!%p1193_p13)
}
  0x7d   : > { %s1197_s27 = scalar_lea.vmem %s339_s14, 128  ;;  %s1309_s8 = smov [#allocation7]  }
  0x7e   : > { %p1198_p7 = scmp.ne.s32.totalorder %s339_s14, %s1197_s27  ;;  %s1202_s23 = sshll.u32 %s1309_s8, 4  ;;  %s1203_s23 = int_to_ptr.vmem [resolvable:$false] %s1202_s23 }
  0x7f   : > { %s1204_s1 = scalar_lea.vmem %s1203_s23, 256  ;;  %p1205_p8 = scmp.lt.s32.totalorder %s339_s14, %s1203_s23 }
  0x80   : > { %p1200_p3 = pnand %p1198_p7, %p1871_p9  ;;  %p1206_p12 = scmp.lt.s32.totalorder %s1204_s1, %s1197_s27 }
  0x82   : > { %p1201_p6 = pneg %p1200_p3  ;;  %p1207_p4 = por %p1206_p12, %p1205_p8 }
  0x84   : > { %p1208_p0 = pnand %p1207_p4, %p1201_p6 }
  0x86   : > { %1211 = shalt.err (!%p1208_p0)
}
  0x87   : > { %p1875_p2 = scmp.ne.s32.totalorder %s1860_s7, 0  ;;  %p1876_p1 = scmp.ne.s32.totalorder %s1869_s12, 0 }
  0x88   : > { %s1575_s25 = sand.u32 (!%p1876_p1), 1, %s1286_s19   ;;  %p1877_p9 = scmp.ne.s32.totalorder (!%p1876_p1), %s1864_s11, 0 }
  0x89   : > { %1031 = dma.hbm_to_vmem [thread:$0]  (!%p1875_p2), %s1550_s30, 128, %s339_s14, %s1419_s16  }
  0x8a   : > { %347 = sbr.rel (%p1876_p1) target bundleno = 229 (0xe5), region = 40  ;;  %s986_s18 = sshll.u32 (!%p1876_p1), %s1575_s25, 6 }
  0x8b   : > { %s350_s24 = scalar_lea.sflag (!%p1876_p1), [#allocation3], %s1575_s25  ;;  %s1581_s15 = scalar_lea.vmem (!%p1876_p1), [#allocation2], %s986_s18 }
  0x91   : > { %1265 = dma.done.wait (%p1877_p9), %s350_s24, 1024  }
  0x92   : > { %1267 = vsyncadd (%p1877_p9), %s350_s24, 4294966272  ;;  %s358_s7 = sand.u32 1, %s1450_s17   ;;  %s987_s16 = sshll.u32 %s1575_s25, 3 }
  0x93   : > { %s359_s12 = scalar_lea.sflag [#allocation6], %s358_s7  ;;  %s362_s30 = scalar_lea.vmem [#allocation5], %s987_s16 }
  0x94   : > { %1269 = dma.done.wait (%p1877_p9), %s359_s12, 256  }
  0x95   : > { %1271 = vsyncadd (%p1877_p9), %s359_s12, 4294967040  ;;  %s1593_s9 = scalar_lea.vmem [#allocation7], %s987_s16  ;;  %p1878_p4 = scmp.eq.s32.totalorder %s1450_s17, 0 }
  0x97   : > { %1273 = dma.done.wait (%p1878_p4), [#allocation9], 256   ;;  %p1879_p11 = pmov %p1878_p4 }
  0x98   : > { %v497_v0 = vlaneseq  ;;  %v1310_v4 = vmov 0.0   ;;  %v428_v7 = vld [vmem:[%s1581_s15] sm:$0xff]  ;;  %v1603_v8 = vld [vmem:[%s1581_s15 + $0x8] sm:$0xff]  ;;  %v430_v42 = vld [vmem:[%s1581_s15 + $0x10] sm:$0xff]  ;;  %s1706_s26 = scalar_lea.vmem [#allocation10], %s986_s18  ;;  %s1004_s29 = sshll.u32 %s1294_s21, 10 }
  0x99   : > { %1275 = vsyncadd (%p1879_p11), [#allocation9], 4294967040  ;;  %v436_v9 = vld [vmem:[%s362_s30] sm:$0xff]  ;;  %v518_v15 = vrot.slane %v428_v7, 7  ;;  %v519_v16 = vrot.slane %v1603_v8, 7  ;;  %v590_v28 = vrot.slane %v428_v7, 1  ;;  %s1780_s10 = scalar_lea.hbm %s1836_s5, %s1004_s29 }
  0x9a   : > { %v498_v1 = vshrl.u32 %v497_v0, 7  ;;  %v438_v13 = vld [vmem:[#allocation8] sm:$0xff]  ;;  %v517_v14 = vrot.slane %v436_v9, 7  ;;  %v561_v19 = vmul.f32 0.0, %v436_v9  ;;  %v589_v24 = vrot.slane %v436_v9, 1  ;;  %v1647_v55 = vld [vmem:[%s1581_s15 + $0x18] sm:$0xff] }
  0x9b   : > { %v591_v29 = vrot.slane %v1603_v8, 1  ;;  %v1626_v37 = vld [vmem:[#allocation8 + $0x8] ss:$0 sm:$0xff]  ;;  %v520_v53 = vrot.slane %v430_v42, 7  ;;  %v592_v59 = vrot.slane %v430_v42, 1  ;;  %s805_s14 = sshll.u32 %s1706_s26, 4  ;;  %s1775_s14 = int_to_ptr.vmem [resolvable:$true] %s805_s14 }
  0x9c   : > { %vm499_vm0 = vcmp.ge.s32.totalorder %v498_v1, 1  ;;  %vm502_vm1 = vcmp.le.s32.totalorder %v498_v1, 6  ;;  %v507_v2 = vsub.s32 4, %v498_v1  ;;  %v571_v3 = vsub.s32 1, %v498_v1  ;;  %s789_s20 = scalar_lea.sflag [#allocation4], %s1575_s25  ;;  %s1212_s22 = scalar_lea.vmem %s1775_s14, 1024 }
  0x9d   : > { %v1599_v5 = vsel %vm499_vm0, 1.0, %v1310_v4  ;;  %v543_v6 = vsub.s32 0, %v498_v1  ;;  %v1605_v10 = vsel %vm502_vm1, 1.0, %v1310_v4  ;;  %v615_v11 = vsub.s32 2, %v498_v1  ;;  %p1213_p5 = scmp.ne.s32.totalorder %s1775_s14, %s1212_s22  ;;  %p1880_p10 = scmp.ne.s32.totalorder %s1866_s13, 0 }
  0x9e   : > { %v637_v12 = vsub.s32 3, %v498_v1  ;;  %v659_v17 = vsub.s32 5, %v498_v1  ;;  %v1608_v18 = vrot.slane %v438_v13, %v507_v2  ;;  %v1610_v20 = vrot.slane %v438_v13, %v571_v3  ;;  %s1311_s21 = smov [#allocation10]  }
  0x9f   : > { %v689_v21 = vsub.s32 6, %v498_v1  ;;  %v525_v22 = vmul.f32 %v1599_v5, %v517_v14  ;;  %v1613_v23 = vrot.slane %v438_v13, %v543_v6  ;;  %v717_v25 = vsub.s32 7, %v498_v1  ;;  %p1214_p13 = pnand %p1213_p5, %p1880_p10  ;;  %s1216_s27 = sshll.u32 %s1311_s21, 4  ;;  %s1217_s27 = int_to_ptr.vmem [resolvable:$false] %s1216_s27 }
  0xa0   : > { %v526_v26 = vmul.f32 %v1599_v5, %v518_v15  ;;  %v527_v27 = vmul.f32 %v1599_v5, %v519_v16  ;;  %v509_v30 = vmul.f32 %v1608_v18, %v428_v7  ;;  %v597_v32 = vmul.f32 %v1605_v10, %v589_v24  ;;  %s1218_s8 = scalar_lea.vmem %s1217_s27, 2048  ;;  %p1219_p3 = scmp.lt.s32.totalorder %s1775_s14, %s1217_s27 }
  0xa1   : > { %v533_v31 = vmul.f32 0.0, %v525_v22  ;;  %v573_v33 = vmul.f32 %v1610_v20, %v561_v19  ;;  %v599_v34 = vmul.f32 %v1605_v10, %v591_v29  ;;  %v1622_v35 = vrot.slane %v438_v13, %v615_v11  ;;  %p1215_p7 = pneg %p1214_p13  ;;  %p1220_p6 = scmp.lt.s32.totalorder %s1218_s8, %s1212_s22 }
  0xa2   : > { %v1624_v36 = vrot.slane %v438_v13, %v637_v12  ;;  %v605_v39 = vmul.f32 0.0, %v597_v32  ;;  %v1629_v40 = vrot.slane %v438_v13, %v659_v17  ;;  %v1631_v41 = vrot.slane %v438_v13, %v689_v21  ;;  %v1668_v21 = vld [vmem:[%s1581_s15 + $0x20] sm:$0xff] }
  0xa3   : > { %v545_v38 = vmul.f32 %v1613_v23, %v533_v31  ;;  %v546_v43 = vmul.f32 %v1613_v23, %v526_v26  ;;  %v547_v44 = vmul.f32 %v1613_v23, %v527_v27  ;;  %v598_v45 = vmul.f32 %v1605_v10, %v590_v28  ;;  %p1221_p8 = por %p1220_p6, %p1219_p3 }
  0xa4   : > { %v1637_v46 = vrot.slane %v438_v13, %v717_v25  ;;  %v617_v48 = vmul.f32 %v1622_v35, %v605_v39  ;;  %v619_v49 = vmul.f32 %v1622_v35, %v599_v34  ;;  %v639_v50 = vmul.f32 %v1624_v36, %v526_v26 }
  0xa5   : > { %v553_v47 = vadd.f32 %v545_v38, %v509_v30  ;;  %v749_v51 = vmul.f32 %v1626_v37, %v599_v34  ;;  %v510_v52 = vmul.f32 %v1608_v18, %v1603_v8  ;;  %v574_v54 = vmul.f32 %v1610_v20, %v428_v7  ;;  %p1222_p12 = pnand %p1221_p8, %p1215_p7 }
  0xa6   : > { %v661_v57 = vmul.f32 %v1629_v40, %v598_v45  ;;  %v691_v58 = vmul.f32 %v1631_v41, %v527_v27  ;;  %v719_v60 = vmul.f32 %v1637_v46, %v1603_v8  ;;  %v528_v61 = vmul.f32 %v1599_v5, %v520_v53 }
  0xa7   : > { %v581_v56 = vadd.f32 %v573_v33, %v553_v47  ;;  %v554_v62 = vadd.f32 %v546_v43, %v510_v52  ;;  %v618_v63 = vmul.f32 %v1622_v35, %v598_v45  ;;  %v600_v1 = vmul.f32 %v1605_v10, %v592_v59  ;;  %v1694_v59 = vld [vmem:[%s1581_s15 + $0x28] sm:$0xff] }
  0xa8   : > { %v511_v2 = vmul.f32 %v1608_v18, %v430_v42  ;;  %v521_v3 = vrot.slane %v1647_v55, 7  ;;  %v640_v6 = vmul.f32 %v1624_v36, %v527_v27  ;;  %v662_v7 = vmul.f32 %v1629_v40, %v599_v34 }
  0xa9   : > { %v625_v0 = vadd.f32 %v617_v48, %v581_v56  ;;  %v582_v4 = vadd.f32 %v574_v54, %v554_v62  ;;  %v575_v9 = vmul.f32 %v1610_v20, %v1603_v8  ;;  %v548_v12 = vmul.f32 %v1613_v23, %v528_v61 }
  0xaa   : > { %v720_v13 = vmul.f32 %v1637_v46, %v430_v42  ;;  %v529_v14 = vmul.f32 %v1599_v5, %v521_v3  ;;  %v692_v16 = vmul.f32 %v1631_v41, %v528_v61  ;;  %v555_v17 = vadd.f32 %v547_v44, %v511_v2 }
  0xab   : > { %v647_v11 = vadd.f32 %v639_v50, %v625_v0  ;;  %v626_v15 = vadd.f32 %v618_v63, %v582_v4  ;;  %v593_v19 = vrot.slane %v1647_v55, 1  ;;  %v620_v24 = vmul.f32 %v1622_v35, %v600_v1  ;;  %v1686_v50 = vld [vmem:[%s1835_s4] ss:$0 sm:$0xff] }
  0xac   : > { %v750_v8 = vmul.f32 %v1626_v37, %v600_v1  ;;  %v641_v25 = vmul.f32 %v1624_v36, %v528_v61  ;;  %v549_v27 = vmul.f32 %v1613_v23, %v529_v14  ;;  %v583_v28 = vadd.f32 %v575_v9, %v555_v17 }
  0xad   : > { %v669_v22 = vadd.f32 %v661_v57, %v647_v11  ;;  %v648_v26 = vadd.f32 %v640_v6, %v626_v15  ;;  %v601_v29 = vmul.f32 %v1605_v10, %v593_v19  ;;  %v512_v31 = vmul.f32 %v1608_v18, %v1647_v55 }
  0xae   : > { %v522_v32 = vrot.slane %v1668_v21, 7  ;;  %v576_v33 = vmul.f32 %v1610_v20, %v430_v42  ;;  %v627_v38 = vadd.f32 %v619_v49, %v583_v28  ;;  %v663_v39 = vmul.f32 %v1629_v40, %v600_v1 }
  0xaf   : > { %v699_v30 = vadd.f32 %v691_v58, %v669_v22  ;;  %v670_v34 = vadd.f32 %v662_v7, %v648_v26  ;;  %v693_v43 = vmul.f32 %v1631_v41, %v529_v14  ;;  %v556_v47 = vadd.f32 %v548_v12, %v512_v31 }
  0xb0   : > { %v530_v45 = vmul.f32 %v1599_v5, %v522_v32  ;;  %v594_v48 = vrot.slane %v1668_v21, 1  ;;  %v621_v42 = vmul.f32 %v1622_v35, %v601_v29  ;;  %v649_v49 = vadd.f32 %v641_v25, %v627_v38  ;;  %v434_v25 = vld [vmem:[%s1581_s15 + $0x30] sm:$0xff] }
  0xb1   : > { %v727_v44 = vadd.f32 %v719_v60, %v699_v30  ;;  %v700_v52 = vadd.f32 %v692_v16, %v670_v34  ;;  %v721_v53 = vmul.f32 %v1637_v46, %v1647_v55  ;;  %v751_v56 = vmul.f32 %v1626_v37, %v601_v29 }
  0xb2   : > { %v584_v57 = vadd.f32 %v576_v33, %v556_v47  ;;  %v642_v58 = vmul.f32 %v1624_v36, %v529_v14  ;;  %v671_v61 = vadd.f32 %v663_v39, %v649_v49  ;;  %v550_v62 = vmul.f32 %v1613_v23, %v530_v45 }
  0xb3   : > { %v757_v54 = vadd.f32 %v749_v51, %v727_v44  ;;  %v728_v60 = vadd.f32 %v720_v13, %v700_v52  ;;  %v664_v63 = vmul.f32 %v1629_v40, %v601_v29  ;;  %v602_v1 = vmul.f32 %v1605_v10, %v594_v48 }
  0xb4   : > { %v628_v2 = vadd.f32 %v620_v24, %v584_v57  ;;  %v694_v51 = vmul.f32 %v1631_v41, %v530_v45  ;;  %v701_v4 = vadd.f32 %v693_v43, %v671_v61  ;;  %v513_v6 = vmul.f32 %v1608_v18, %v1668_v21 }
  0xb5   : > { %v772_v0 = vadd.f32 %v1686_v50, %v757_v54  ;;  %v758_v3 = vadd.f32 %v750_v8, %v728_v60  ;;  %v523_v7 = vrot.slane %v1694_v59, 7  ;;  %v722_v11 = vmul.f32 %v1637_v46, %v1668_v21  ;;  %v435_v54 = vld [vmem:[%s1581_s15 + $0x38] sm:$0xff] }
  0xb6   : > { %v650_v9 = vadd.f32 %v642_v58, %v628_v2  ;;  %v577_v12 = vmul.f32 %v1610_v20, %v1647_v55  ;;  %v595_v13 = vrot.slane %v1694_v59, 1  ;;  %v729_v15 = vadd.f32 %v721_v53, %v701_v4 }
  0xb7   : > { %780 = vst [vmem:[%s1706_s26] sm:$0xff] %v772_v0  ;;  %v773_v14 = vadd.f32 %v1686_v50, %v758_v3  ;;  %v531_v16 = vmul.f32 %v1599_v5, %v523_v7  ;;  %v557_v17 = vadd.f32 %v549_v27, %v513_v6  ;;  %v622_v19 = vmul.f32 %v1622_v35, %v602_v1 }
  0xb8   : > { %v672_v22 = vadd.f32 %v664_v63, %v650_v9  ;;  %v752_v24 = vmul.f32 %v1626_v37, %v602_v1  ;;  %v643_v8 = vmul.f32 %v1624_v36, %v530_v45  ;;  %v759_v26 = vadd.f32 %v751_v56, %v729_v15 }
  0xb9   : > { %781 = vst [vmem:[%s1706_s26 + $0x8] sm:$0xff] %v773_v14  ;;  %v585_v55 = vadd.f32 %v577_v12, %v557_v17  ;;  %v603_v28 = vmul.f32 %v1605_v10, %v595_v13  ;;  %v665_v29 = vmul.f32 %v1629_v40, %v602_v1  ;;  %v551_v31 = vmul.f32 %v1613_v23, %v531_v16  ;;  %v437_v17 = vld [vmem:[%s1593_s9] sm:$0xff] }
  0xba   : > { %v702_v30 = vadd.f32 %v694_v51, %v672_v22  ;;  %v723_v27 = vmul.f32 %v1637_v46, %v1694_v59  ;;  %v514_v32 = vmul.f32 %v1608_v18, %v1694_v59  ;;  %v774_v33 = vadd.f32 %v1686_v50, %v759_v26 }
  0xbb   : > { %v629_v34 = vadd.f32 %v621_v42, %v585_v55  ;;  %v524_v38 = vrot.slane %v434_v25, 7  ;;  %v578_v39 = vmul.f32 %v1610_v20, %v1668_v21  ;;  %v695_v44 = vmul.f32 %v1631_v41, %v531_v16 }
  0xbc   : > { %v730_v43 = vadd.f32 %v722_v11, %v702_v30  ;;  %v558_v45 = vadd.f32 %v550_v62, %v514_v32  ;;  %v596_v47 = vrot.slane %v434_v25, 1  ;;  %782 = vst [vmem:[%s1706_s26 + $0x10] sm:$0xff] %v774_v33  ;;  %v623_v48 = vmul.f32 %v1622_v35, %v603_v28 }
  0xbd   : > { %v651_v52 = vadd.f32 %v643_v8, %v629_v34  ;;  %v532_v49 = vmul.f32 %v1599_v5, %v524_v38  ;;  %v644_v53 = vmul.f32 %v1624_v36, %v531_v16  ;;  %v515_v21 = vmul.f32 %v1608_v18, %v434_v25 }
  0xbe   : > { %v760_v56 = vadd.f32 %v752_v24, %v730_v43  ;;  %v586_v42 = vadd.f32 %v578_v39, %v558_v45  ;;  %v604_v57 = vmul.f32 %v1605_v10, %v596_v47  ;;  %v753_v60 = vmul.f32 %v1626_v37, %v603_v28 }
  0xbf   : > { %v673_v58 = vadd.f32 %v665_v29, %v651_v52  ;;  %v666_v61 = vmul.f32 %v1629_v40, %v603_v28  ;;  %v724_v62 = vmul.f32 %v1637_v46, %v434_v25  ;;  %v552_v0 = vmul.f32 %v1613_v23, %v532_v49 }
  0xc0   : > { %v775_v63 = vadd.f32 %v1686_v50, %v760_v56  ;;  %v630_v1 = vadd.f32 %v622_v19, %v586_v42  ;;  %v516_v2 = vmul.f32 %v1608_v18, %v435_v54  ;;  %v559_v3 = vadd.f32 %v551_v31, %v515_v21 }
  0xc1   : > { %v703_v51 = vadd.f32 %v695_v44, %v673_v58  ;;  %v579_v4 = vmul.f32 %v1610_v20, %v1694_v59  ;;  %v633_v6 = vrot.slane %v435_v54, 7  ;;  %v624_v7 = vmul.f32 %v1622_v35, %v604_v57 }
  0xc2   : > { %783 = vst [vmem:[%s1706_s26 + $0x18] sm:$0xff] %v775_v63  ;;  %v652_v9 = vadd.f32 %v644_v53, %v630_v1  ;;  %v696_v11 = vmul.f32 %v1631_v41, %v532_v49  ;;  %v655_v12 = vrot.slane %v435_v54, 1  ;;  %v645_v18 = vmul.f32 %v1624_v36, %v532_v49 }
  0xc3   : > { %v731_v13 = vadd.f32 %v723_v27, %v703_v51  ;;  %v587_v14 = vadd.f32 %v579_v4, %v559_v3  ;;  %v634_v23 = vmul.f32 %v1599_v5, %v633_v6  ;;  %v560_v19 = vadd.f32 %v552_v0, %v516_v2 }
  0xc4   : > { %v674_v15 = vadd.f32 %v666_v61, %v652_v9  ;;  %v656_v16 = vmul.f32 %v1605_v10, %v655_v12  ;;  %v580_v59 = vmul.f32 %v1610_v20, %v434_v25  ;;  %v667_v24 = vmul.f32 %v1629_v40, %v604_v57 }
  0xc5   : > { %v761_v22 = vadd.f32 %v753_v60, %v731_v13  ;;  %v631_v35 = vadd.f32 %v623_v48, %v587_v14  ;;  %v754_v26 = vmul.f32 %v1626_v37, %v604_v57  ;;  %v646_v28 = vmul.f32 %v1624_v36, %v634_v23 }
  0xc6   : > { %v704_v8 = vadd.f32 %v696_v11, %v674_v15  ;;  %v588_v55 = vadd.f32 %v580_v59, %v560_v19  ;;  %v697_v31 = vmul.f32 %v1631_v41, %v634_v23  ;;  %v677_v27 = vrot.slane %v437_v17, 7 }
  0xc7   : > { %v776_v29 = vadd.f32 %v1686_v50, %v761_v22  ;;  %v653_v30 = vadd.f32 %v645_v18, %v631_v35  ;;  %v668_v20 = vmul.f32 %v1629_v40, %v656_v16  ;;  %v735_v33 = vrot.slane %v437_v17, 1 }
  0xc8   : > { %v732_v32 = vadd.f32 %v724_v62, %v704_v8  ;;  %v632_v25 = vadd.f32 %v624_v7, %v588_v55  ;;  %v725_v38 = vmul.f32 %v1637_v46, %v435_v54  ;;  %v678_v39 = vmul.f32 %v1599_v5, %v677_v27 }
  0xc9   : > { %784 = vst [vmem:[%s1706_s26 + $0x20] sm:$0xff] %v776_v29  ;;  %v675_v34 = vadd.f32 %v667_v24, %v653_v30  ;;  %v714_v43 = vmul.f32 0.0, %v437_v17  ;;  %v736_v45 = vmul.f32 %v1605_v10, %v735_v33  ;;  %v755_v48 = vmul.f32 %v1626_v37, %v656_v16 }
  0xca   : > { %v762_v36 = vadd.f32 %v754_v26, %v732_v32  ;;  %v654_v44 = vadd.f32 %v646_v28, %v632_v25  ;;  %v686_v40 = vmul.f32 0.0, %v678_v39 }
  0xcb   : > { %v705_v47 = vadd.f32 %v697_v31, %v675_v34  ;;  %v744_v53 = vmul.f32 0.0, %v736_v45  ;;  %v726_v54 = vmul.f32 %v1637_v46, %v714_v43 }
  0xcc   : > { %v777_v52 = vadd.f32 %v1686_v50, %v762_v36  ;;  %v676_v49 = vadd.f32 %v668_v20, %v654_v44  ;;  %v698_v5 = vmul.f32 %v1631_v41, %v686_v40 }
  0xcd   : > { %v733_v56 = vadd.f32 %v725_v38, %v705_v47  ;;  %v756_v57 = vmul.f32 %v1626_v37, %v744_v53 }
  0xce   : > { %785 = vst [vmem:[%s1706_s26 + $0x28] sm:$0xff] %v777_v52  ;;  %v706_v10 = vadd.f32 %v698_v5, %v676_v49 }
  0xcf   : > { %v763_v42 = vadd.f32 %v755_v48, %v733_v56 }
  0xd0   : > { %v734_v58 = vadd.f32 %v726_v54, %v706_v10 }
  0xd1   : > { %v778_v21 = vadd.f32 %v1686_v50, %v763_v42 }
  0xd2   : > { %v764_v60 = vadd.f32 %v756_v57, %v734_v58 }
  0xd3   : > { %786 = vst [vmem:[%s1706_s26 + $0x30] sm:$0xff] %v778_v21 }
  0xd4   : > { %v779_v41 = vadd.f32 %v1686_v50, %v764_v60 }
  0xd6   : > { %787 = vst [vmem:[%s1706_s26 + $0x38] sm:$0xff] %v779_v41 }
  0xd7   : > { %1225 = shalt.err (!%p1222_p12)
}
  0xd8   : > { %s1226_s23 = scalar_lea.hbm %s1780_s10, 1024  ;;  %s1230_s24 = scalar_lea.hbm %s1836_s5, 2048 }
  0xd9   : > { %p1227_p0 = scmp.ne.s32.totalorder %s1780_s10, %s1226_s23  ;;  %p1231_p9 = scmp.lt.u32.totalorder %s1780_s10, %s1836_s5 }
  0xda   : > { %p1232_p4 = scmp.lt.u32.totalorder %s1230_s24, %s1226_s23  ;;  %p1234_p5 = scmp.lt.u32.totalorder %s1226_s23, %s1780_s10 }
  0xdb   : > { %p1228_p2 = pnand %p1227_p0, %p1880_p10 }
  0xdc   : > { %p1233_p11 = por %p1232_p4, %p1231_p9 }
  0xdd   : > { %p1229_p1 = pneg %p1228_p2 }
  0xde   : > { %p1235_p13 = por %p1234_p5, %p1233_p11 }
  0xe0   : > { %p1236_p7 = pnand %p1235_p13, %p1229_p1 }
  0xe2   : > { %1239 = shalt.err (!%p1236_p7)
}
  0xe3   : > { %s1312_s16 = smov 128   ;;  %s1313_s12 = smov 8  }
  0xe4   : > { %1016 = dma.vmem_to_hbm [thread:$0]  (%p1880_p10), %s1775_s14, 1024, %s1780_s10, %s789_s20, %s1312_s16, %s1312_s16, %s1313_s12  }
  0xe5 PF: > { %s1881_s30 = sld [smem:[#allocation15_spill]]  ;;  %s1882_s9 = sld [smem:[#allocation21_spill]] }
  0xe6   : > { %s1883_s17 = sld [smem:[#allocation18_spill]] }
  0xeb   : > { %s820_s11 = sand.u32 1, %s1881_s30   ;;  %p1884_p3 = scmp.ne.s32.totalorder %s1882_s9, 0 }
  0xec   : > { %p1885_p6 = scmp.ge.s32.totalorder %s1883_s17, 2  ;;  %s821_s26 = scalar_lea.sflag [#allocation4], %s820_s11 }
  0xee   : > { %p1033_p8 = pnand %p1885_p6, %p1884_p3 }
  0xf0   : > { %1277 = dma.done.wait (!%p1033_p8), %s821_s26, 1024  }
  0xf1   : > { %1279 = vsyncadd (!%p1033_p8), %s821_s26, 4294966272  ;;  %s25_s23 = sadd.s32 1, %s1883_s17   ;;  %s1886_s29 = sld [smem:[#allocation16_spill]] }
  0xf2   : > { %p22_p12 = scmp.ge.s32.totalorder %s25_s23, 4   ;;  %s1887_s20 = sld [smem:[#allocation20_spill]] }
  0xf3   : > { %s1888_s21 = sld [smem:[#allocation17_spill]]  ;;  %s1889_s22 = sld [smem:[#allocation19_spill]] }
  0xf4   : > { %s1890_s18 = smov %s1286_s19  ;;  %24 = sbr.rel (!%p22_p12) target bundleno = 11 (0xb), region = 117 }
  0xf7   : > { %s1891_s19 = smov %s1886_s29 }
  0xfb   :  { %826 = vsyncpa [#allocation3], 1 }
  0xfc   :  { %828 = vsyncpa [#allocation3 + $0x1], 1 }
  0xfd   :  { %829 = vsyncpa [#allocation6], 1 }
  0xfe   :  { %831 = vsyncpa [#allocation6 + $0x1], 1 }
  0xff   :  { %832 = vsyncpa [#allocation9], 1 }
 0x100   :  { %833 = vsyncpa [#allocation4], 1 }
 0x101   :  { %835 = vsyncpa [#allocation4 + $0x1], 1 }

</bundles_post_ra>
